<compile_context>
chip_gen: v7x
topology: tpu7x:2x2x1
jax: 0.10.0
libtpu: 0.0.40
codegen_flags: <defaults>
</compile_context>

<pallas_src>
import jax
import jax.numpy as jnp
from jax import lax
from jax.experimental import pallas as pl
from jax.experimental.pallas import tpu as pltpu

OBS = 32          # observation dimension
HID = 32          # agent hidden width
ACT = 8           # number of discrete actions
BATCH_TILE = 8    # sublane-aligned batch tile per grid step
OUT_LANES = 128   # lane-dense packed output width


def _policy_kernel(x_ref, bits_ref, w1_ref, b1_ref, wh_ref, bh_ref, out_ref):
    # ---- agent MLP: hidden = relu(x @ W1 + b1) ----
    x = x_ref[...]                                                   # (TB, OBS)
    h = jnp.dot(x, w1_ref[...], preferred_element_type=jnp.float32) + b1_ref[...]
    h = jnp.maximum(h, 0.0)                                          # (TB, HID)

    # ---- fused heads: one matmul -> [action_scores | value] ----
    head = jnp.dot(h, wh_ref[...], preferred_element_type=jnp.float32) + bh_ref[...]
    scores = head[:, :ACT]                                           # (TB, ACT)
    value = head[:, ACT:ACT + 1]                                     # (TB, 1)

    # ---- log-softmax over actions (numerically stable) ----
    m = jnp.max(scores, axis=-1, keepdims=True)
    z = scores - m
    lse = jnp.log(jnp.sum(jnp.exp(z), axis=-1, keepdims=True))
    log_probs = z - lse                                              # (TB, ACT)

    # ---- Categorical sampling via Gumbel-max (uint32 bits supplied by host) ----
    bits = bits_ref[...]                                             # (TB, ACT) uint32
    u = (lax.shift_right_logical(bits, jnp.uint32(8)).astype(jnp.float32)
         + 0.5) * (1.0 / (1 << 24))                                  # uniform in (0, 1)
    gumbel = -jnp.log(-jnp.log(u))
    perturbed = log_probs + gumbel                                   # (TB, ACT)

    # argmax along the action axis (iota + masked max; >=2D iota for TPU)
    idx = lax.broadcasted_iota(jnp.int32, perturbed.shape, 1)
    pmax = jnp.max(perturbed, axis=-1, keepdims=True)
    action = jnp.max(jnp.where(perturbed == pmax, idx, -1),
                     axis=-1, keepdims=True)                         # (TB, 1) int32

    # log_prob of the sampled action
    logp = jnp.sum(jnp.where(idx == action, log_probs, 0.0),
                   axis=-1, keepdims=True)                           # (TB, 1)

    # ---- pack (action, log_prob, value) into one lane-dense f32 slab ----
    lane = lax.broadcasted_iota(jnp.int32, out_ref.shape, 1)         # (TB, 128)
    packed = jnp.where(lane == 0, action.astype(jnp.float32),
             jnp.where(lane == 1, logp,
             jnp.where(lane == 2, value, 0.0)))
    out_ref[...] = packed


@jax.jit
def policy_forward_pallas(states, bits, w1, b1, w_head, b_head):
    """states: (B, OBS) with B a multiple of BATCH_TILE; bits: (B, ACT) uint32."""
    B = states.shape[0]
    grid = (B // BATCH_TILE,)
    out = pl.pallas_call(
        _policy_kernel,
        out_shape=jax.ShapeDtypeStruct((B, OUT_LANES), jnp.float32),
        grid=grid,
        in_specs=[
            pl.BlockSpec((BATCH_TILE, OBS), lambda i: (i, 0)),       # states
            pl.BlockSpec((BATCH_TILE, ACT), lambda i: (i, 0)),       # random bits
            pl.BlockSpec((OBS, HID), lambda i: (0, 0)),              # w1
            pl.BlockSpec((1, HID), lambda i: (0, 0)),                # b1
            pl.BlockSpec((HID, ACT + 1), lambda i: (0, 0)),          # fused head W
            pl.BlockSpec((1, ACT + 1), lambda i: (0, 0)),            # fused head b
        ],
        out_specs=pl.BlockSpec((BATCH_TILE, OUT_LANES), lambda i: (i, 0)),
        compiler_params=pltpu.CompilerParams(
            dimension_semantics=("parallel",)),                      # 2-TC sharding on v7x
    )(states, bits, w1, b1, w_head, b_head)
    action = out[:, 0].astype(jnp.int32)
    logp = out[:, 1]
    value = out[:, 2]
    return action, logp, value


class PolicyPallas:
    """Mirror of the PyTorch Policy wrapper (stores sampled log-probs)."""

    def __init__(self, params):
        w1, b1, w2, b2, wv, bv = params
        self.w1, self.b1 = w1, b1
        # Fuse policy head and value head into a single projection.
        self.w_head = jnp.concatenate([w2, wv], axis=1)              # (HID, ACT+1)
        self.b_head = jnp.concatenate([b2, bv], axis=1)              # (1, ACT+1)
        self.saved_log_probs = []
        self.rewards = []
        self._key = jax.random.PRNGKey(1234)

    def forward(self, observation):
        # TODO(synk): for real rollouts, batch many envs/timesteps per pallas_call
        # and keep actions/log_probs on device; the per-step int() host sync here
        # mirrors the PyTorch `action.item()` semantics and dominates wall-clock.
        state = jnp.asarray(observation, dtype=jnp.float32)[None, :]
        state = jnp.pad(state, ((0, BATCH_TILE - 1), (0, 0)))        # pad batch tile
        self._key, sub = jax.random.split(self._key)
        bits = jax.random.bits(sub, (BATCH_TILE, ACT), dtype=jnp.uint32)
        action, logp, _value = policy_forward_pallas(
            state, bits, self.w1, self.b1, self.w_head, self.b_head)
        self.saved_log_probs.append(logp[0])
        return int(action[0])


def _init_params():
    # Deterministic parameter init (synthetic agent weights).
    k = jax.random.PRNGKey(0)
    k1, k2, k3 = jax.random.split(k, 3)
    w1 = jax.random.normal(k1, (OBS, HID), jnp.float32) * (1.0 / jnp.sqrt(OBS))
    b1 = jnp.zeros((1, HID), jnp.float32)
    w2 = jax.random.normal(k2, (HID, ACT), jnp.float32) * (1.0 / jnp.sqrt(HID))
    b2 = jnp.zeros((1, ACT), jnp.float32)
    wv = jax.random.normal(k3, (HID, 1), jnp.float32) * (1.0 / jnp.sqrt(HID))
    bv = jnp.zeros((1, 1), jnp.float32)
    return (w1, b1, w2, b2, wv, bv)


if __name__ == "__main__":
    params = _init_params()
    policy = PolicyPallas(params)

    # Deterministic example observation (what would be the env's numpy obs).
    key = jax.random.PRNGKey(0)
    kobs, kbatch, kbits = jax.random.split(key, 3)
    obs = jax.random.normal(kobs, (OBS,), jnp.float32)

    # Single-step Policy.forward (matches the PyTorch module semantics).
    action = policy.forward(obs)
    jax.block_until_ready(policy.saved_log_probs[-1])
    assert 0 <= action < ACT
    assert bool(jnp.isfinite(policy.saved_log_probs[-1]))

    # Batched inference path (amortizes launch overhead; grid=(2,) here).
    B = 16
    obs_batch = jax.random.normal(kbatch, (B, OBS), jnp.float32)
    bits_batch = jax.random.bits(kbits, (B, ACT), dtype=jnp.uint32)
    actions, logps, values = policy_forward_pallas(
        obs_batch, bits_batch, policy.w1, policy.b1, policy.w_head, policy.b_head)
    jax.block_until_ready(actions)
    assert actions.shape == (B,)
    assert bool(jnp.all((actions >= 0) & (actions < ACT)))
    assert bool(jnp.all(jnp.isfinite(logps)))

    print("KERNEL_OK")
</pallas_src>

<mosaic_0001>
module attributes {stable_mosaic.version = 11 : i64} {
  func.func @_policy_kernel(%arg0: i32, %arg1: memref<8x32xf32, #tpu.memory_space<vmem>>, %arg2: memref<8x8xi32, #tpu.memory_space<vmem>>, %arg3: memref<32x32xf32, #tpu.memory_space<vmem>>, %arg4: memref<1x32xf32, #tpu.memory_space<vmem>>, %arg5: memref<32x9xf32, #tpu.memory_space<vmem>>, %arg6: memref<1x9xf32, #tpu.memory_space<vmem>>, %arg7: memref<8x128xf32, #tpu.memory_space<vmem>>) attributes {dimension_semantics = [#tpu.dimension_semantics<parallel>], iteration_bounds = array<i64: 1>, scalar_prefetch = 0 : i64, scratch_operands = 0 : i64, tpu.core_type = #tpu.core_type<tc>, window_params = [{transform_indices = @transform_0, window_bounds = array<i64: 8, 32>}, {transform_indices = @transform_1, window_bounds = array<i64: 8, 8>}, {pipeline_mode = #tpu.pipeline_mode<synchronous>, transform_indices = @transform_2, window_bounds = array<i64: 32, 32>}, {pipeline_mode = #tpu.pipeline_mode<synchronous>, transform_indices = @transform_3, window_bounds = array<i64: 1, 32>}, {pipeline_mode = #tpu.pipeline_mode<synchronous>, transform_indices = @transform_4, window_bounds = array<i64: 32, 9>}, {pipeline_mode = #tpu.pipeline_mode<synchronous>, transform_indices = @transform_5, window_bounds = array<i64: 1, 9>}, {transform_indices = @transform_6, window_bounds = array<i64: 8, 128>}]} {
    %c0 = arith.constant 0 : index
    %c0_0 = arith.constant 0 : index
    %0 = vector.load %arg1[%c0, %c0_0] : memref<8x32xf32, #tpu.memory_space<vmem>>, vector<8x32xf32>
    %c0_1 = arith.constant 0 : index
    %c0_2 = arith.constant 0 : index
    %1 = vector.load %arg3[%c0_1, %c0_2] : memref<32x32xf32, #tpu.memory_space<vmem>>, vector<32x32xf32>
    %cst = arith.constant dense<0.000000e+00> : vector<8x32xf32>
    %2 = tpu.matmul %0, %1, %cst {dimension_numbers = #tpu.dot_dimension_numbers<[1], [0], [0], [1], [0, 0, 1, 1], [], []>} : vector<8x32xf32>, vector<32x32xf32>, vector<8x32xf32> -> vector<8x32xf32>
    %c0_3 = arith.constant 0 : index
    %c0_4 = arith.constant 0 : index
    %3 = vector.load %arg4[%c0_3, %c0_4] : memref<1x32xf32, #tpu.memory_space<vmem>>, vector<1x32xf32>
    %4 = vector.broadcast %3 : vector<1x32xf32> to vector<8x32xf32>
    %5 = arith.addf %2, %4 : vector<8x32xf32>
    %cst_5 = arith.constant 0.000000e+00 : f32
    %6 = vector.broadcast %cst_5 : f32 to vector<8x32xf32>
    %7 = arith.maximumf %5, %6 : vector<8x32xf32>
    %c0_6 = arith.constant 0 : index
    %c0_7 = arith.constant 0 : index
    %8 = vector.load %arg5[%c0_6, %c0_7] : memref<32x9xf32, #tpu.memory_space<vmem>>, vector<32x9xf32>
    %cst_8 = arith.constant dense<0.000000e+00> : vector<8x9xf32>
    %9 = tpu.matmul %7, %8, %cst_8 {dimension_numbers = #tpu.dot_dimension_numbers<[1], [0], [0], [1], [0, 0, 1, 1], [], []>} : vector<8x32xf32>, vector<32x9xf32>, vector<8x9xf32> -> vector<8x9xf32>
    %c0_9 = arith.constant 0 : index
    %c0_10 = arith.constant 0 : index
    %10 = vector.load %arg6[%c0_9, %c0_10] : memref<1x9xf32, #tpu.memory_space<vmem>>, vector<1x9xf32>
    %11 = vector.broadcast %10 : vector<1x9xf32> to vector<8x9xf32>
    %12 = arith.addf %9, %11 : vector<8x9xf32>
    %13 = vector.extract_strided_slice %12 {offsets = [0, 0], sizes = [8, 8], strides = [1, 1]} : vector<8x9xf32> to vector<8x8xf32>
    %14 = vector.extract_strided_slice %12 {offsets = [0, 8], sizes = [8, 1], strides = [1, 1]} : vector<8x9xf32> to vector<8x1xf32>
    %cst_11 = arith.constant dense<0xFF800000> : vector<8xf32>
    %15 = vector.multi_reduction <maximumf>, %13, %cst_11 [1] : vector<8x8xf32> to vector<8xf32>
    %16 = vector.shape_cast %15 : vector<8xf32> to vector<8x1xf32>
    %17 = vector.broadcast %16 : vector<8x1xf32> to vector<8x8xf32>
    %18 = arith.subf %13, %17 : vector<8x8xf32>
    %19 = math.exp %18 : vector<8x8xf32>
    %cst_12 = arith.constant dense<0.000000e+00> : vector<8xf32>
    %20 = vector.multi_reduction <add>, %19, %cst_12 [1] : vector<8x8xf32> to vector<8xf32>
    %21 = vector.shape_cast %20 : vector<8xf32> to vector<8x1xf32>
    %22 = math.log %21 : vector<8x1xf32>
    %23 = vector.broadcast %22 : vector<8x1xf32> to vector<8x8xf32>
    %24 = arith.subf %18, %23 : vector<8x8xf32>
    %c0_13 = arith.constant 0 : index
    %c0_14 = arith.constant 0 : index
    %25 = vector.load %arg2[%c0_13, %c0_14] : memref<8x8xi32, #tpu.memory_space<vmem>>, vector<8x8xi32>
    %c8_i32 = arith.constant 8 : i32
    %26 = vector.broadcast %c8_i32 : i32 to vector<8x8xi32>
    %27 = arith.shrui %25, %26 : vector<8x8xi32>
    %28 = arith.uitofp %27 : vector<8x8xi32> to vector<8x8xf32>
    %cst_15 = arith.constant 5.000000e-01 : f32
    %29 = vector.broadcast %cst_15 : f32 to vector<8x8xf32>
    %30 = arith.addf %28, %29 : vector<8x8xf32>
    %cst_16 = arith.constant 5.96046448E-8 : f32
    %31 = vector.broadcast %cst_16 : f32 to vector<8x8xf32>
    %32 = arith.mulf %30, %31 : vector<8x8xf32>
    %33 = math.log %32 : vector<8x8xf32>
    %cst_17 = arith.constant 0.000000e+00 : f32
    %34 = vector.broadcast %cst_17 : f32 to vector<8x8xf32>
    %35 = arith.subf %34, %33 : vector<8x8xf32>
    %36 = math.log %35 : vector<8x8xf32>
    %cst_18 = arith.constant 0.000000e+00 : f32
    %37 = vector.broadcast %cst_18 : f32 to vector<8x8xf32>
    %38 = arith.subf %37, %36 : vector<8x8xf32>
    %39 = arith.addf %24, %38 : vector<8x8xf32>
    %40 = tpu.iota {dimensions = array<i32: 1>} : vector<8x8xi32>
    %cst_19 = arith.constant dense<0xFF800000> : vector<8xf32>
    %41 = vector.multi_reduction <maximumf>, %39, %cst_19 [1] : vector<8x8xf32> to vector<8xf32>
    %42 = vector.shape_cast %41 : vector<8xf32> to vector<8x1xf32>
    %43 = vector.broadcast %42 : vector<8x1xf32> to vector<8x8xf32>
    %44 = arith.cmpf oeq, %39, %43 : vector<8x8xf32>
    %c-1_i32 = arith.constant -1 : i32
    %45 = vector.broadcast %c-1_i32 : i32 to vector<8x8xi32>
    %46 = arith.select %44, %40, %45 : vector<8x8xi1>, vector<8x8xi32>
    %cst_20 = arith.constant dense<-2147483648> : vector<8xi32>
    %47 = vector.multi_reduction <maxsi>, %46, %cst_20 [1] : vector<8x8xi32> to vector<8xi32>
    %48 = vector.shape_cast %47 : vector<8xi32> to vector<8x1xi32>
    %49 = vector.broadcast %48 : vector<8x1xi32> to vector<8x8xi32>
    %50 = arith.cmpi eq, %40, %49 : vector<8x8xi32>
    %cst_21 = arith.constant 0.000000e+00 : f32
    %51 = vector.broadcast %cst_21 : f32 to vector<8x8xf32>
    %52 = arith.select %50, %24, %51 : vector<8x8xi1>, vector<8x8xf32>
    %cst_22 = arith.constant dense<0.000000e+00> : vector<8xf32>
    %53 = vector.multi_reduction <add>, %52, %cst_22 [1] : vector<8x8xf32> to vector<8xf32>
    %54 = vector.shape_cast %53 : vector<8xf32> to vector<8x1xf32>
    %55 = tpu.iota {dimensions = array<i32: 1>} : vector<8x128xi32>
    %c0_i32 = arith.constant 0 : i32
    %56 = vector.broadcast %c0_i32 : i32 to vector<8x128xi32>
    %57 = arith.cmpi eq, %55, %56 : vector<8x128xi32>
    %58 = arith.sitofp %48 : vector<8x1xi32> to vector<8x1xf32>
    %c1_i32 = arith.constant 1 : i32
    %59 = vector.broadcast %c1_i32 : i32 to vector<8x128xi32>
    %60 = arith.cmpi eq, %55, %59 : vector<8x128xi32>
    %c2_i32 = arith.constant 2 : i32
    %61 = vector.broadcast %c2_i32 : i32 to vector<8x128xi32>
    %62 = arith.cmpi eq, %55, %61 : vector<8x128xi32>
    %cst_23 = arith.constant 0.000000e+00 : f32
    %63 = vector.shape_cast %14 : vector<8x1xf32> to vector<8x1xf32>
    %64 = vector.broadcast %63 : vector<8x1xf32> to vector<8x128xf32>
    %65 = vector.broadcast %cst_23 : f32 to vector<8x128xf32>
    %66 = arith.select %62, %64, %65 : vector<8x128xi1>, vector<8x128xf32>
    %67 = vector.shape_cast %54 : vector<8x1xf32> to vector<8x1xf32>
    %68 = vector.broadcast %67 : vector<8x1xf32> to vector<8x128xf32>
    %69 = arith.select %60, %68, %66 : vector<8x128xi1>, vector<8x128xf32>
    %70 = vector.shape_cast %58 : vector<8x1xf32> to vector<8x1xf32>
    %71 = vector.broadcast %70 : vector<8x1xf32> to vector<8x128xf32>
    %72 = arith.select %57, %71, %69 : vector<8x128xi1>, vector<8x128xf32>
    %c0_24 = arith.constant 0 : index
    %c0_25 = arith.constant 0 : index
    %73 = vector.load %arg7[%c0_24, %c0_25] : memref<8x128xf32, #tpu.memory_space<vmem>>, vector<8x128xf32>
    tpu.vector_store %arg7[%c0_24, %c0_25], %72 {strides = array<i32>} : memref<8x128xf32, #tpu.memory_space<vmem>>, vector<8x128xf32>,
    return
  }
  func.func @transform_0(%arg0: i32) -> (i32, i32) {
    %c0_i32 = arith.constant 0 : i32
    %c0_i32_0 = arith.constant 0 : i32
    return %arg0, %c0_i32 : i32, i32
  }
  func.func @transform_1(%arg0: i32) -> (i32, i32) {
    %c0_i32 = arith.constant 0 : i32
    %c0_i32_0 = arith.constant 0 : i32
    return %arg0, %c0_i32 : i32, i32
  }
  func.func @transform_2(%arg0: i32) -> (i32, i32) {
    %c0_i32 = arith.constant 0 : i32
    %c0_i32_0 = arith.constant 0 : i32
    %c0_i32_1 = arith.constant 0 : i32
    return %c0_i32, %c0_i32_0 : i32, i32
  }
  func.func @transform_3(%arg0: i32) -> (i32, i32) {
    %c0_i32 = arith.constant 0 : i32
    %c0_i32_0 = arith.constant 0 : i32
    %c0_i32_1 = arith.constant 0 : i32
    return %c0_i32, %c0_i32_0 : i32, i32
  }
  func.func @transform_4(%arg0: i32) -> (i32, i32) {
    %c0_i32 = arith.constant 0 : i32
    %c0_i32_0 = arith.constant 0 : i32
    %c0_i32_1 = arith.constant 0 : i32
    return %c0_i32, %c0_i32_0 : i32, i32
  }
  func.func @transform_5(%arg0: i32) -> (i32, i32) {
    %c0_i32 = arith.constant 0 : i32
    %c0_i32_0 = arith.constant 0 : i32
    %c0_i32_1 = arith.constant 0 : i32
    return %c0_i32, %c0_i32_0 : i32, i32
  }
  func.func @transform_6(%arg0: i32) -> (i32, i32) {
    %c0_i32 = arith.constant 0 : i32
    %c0_i32_0 = arith.constant 0 : i32
    return %arg0, %c0_i32 : i32, i32
  }
}

</mosaic_0001>

<bundles_post_ra>
// kernel: policy_forward_pallas.1
= control target key start
LH: loop header
LB: loop body
LE: loop exit
PB: predicated region body
PF: predicated region fallthrough
CT: control target
= control target key end

     0   :  { %v329_v0 = vmov 0.0|0.0   ;;  %vm330_vm0 = vmmov 0   ;;  %v331_v4 = vmov 0.0   ;;  %vm35_vm1 = vcmask 261120   ;;  %s412_s2 = inlined_call_operand.vmem [shape: f32[32,32], index: 2, kind: input, shape index: {}]   ;;  %s413_s4 = inlined_call_operand.vmem [shape: f32[32,9], index: 4, kind: input, shape index: {}]   ;;  %s414_s0 = inlined_call_operand.vmem [shape: f32[8,32], index: 0, kind: input, shape index: {}]   ;;  %s415_s3 = inlined_call_operand.vmem [shape: f32[1,32], index: 3, kind: input, shape index: {}]   ;;  %s416_s5 = inlined_call_operand.vmem [shape: f32[1,9], index: 5, kind: input, shape index: {}]   ;;  %s417_s1 = inlined_call_operand.vmem [shape: u32[8,8], index: 1, kind: input, shape index: {}]   ;;  %s418_s6 = inlined_call_operand.vmem [shape: f32[8,128], index: 6, kind: output, shape index: {}]  }
   0x1   :  { %304 = vmatprep.subr.bf16.mxu0 %v329_v0  ;;  %v24_v1 = vld [vmem:[%s412_s2] sm:$0xff]  ;;  %v25_v2 = vld [vmem:[%s412_s2 + $0x8] sm:$0xff]  ;;  %v26_v3 = vld [vmem:[%s412_s2 + $0x10] sm:$0xff]  ;;  %290 = vmatprep.mubr.msk.f32.mxu0 %vm330_vm0, %v331_v4  ;;  %vm194_vm2 = vcmask 64512   ;;  %v224_v52 = vlaneseq  ;;  %v332_v59 = vmov 8  }
   0x2   :  { %v305_v5 = vpack.c.bf16 %v25_v2, %v24_v1  ;;  %v27_v6 = vld [vmem:[%s412_s2 + $0x18] sm:$0xff]  ;;  %310 = vmatprep.subr.bf16.mxu1 %v329_v0  ;;  %v110_v7 = vld [vmem:[%s413_s4] sm:$0xff]  ;;  %301 = vmatprep.mubr.msk.f32.mxu1 %vm330_vm0, %v331_v4  ;;  %v111_v8 = vld [vmem:[%s413_s4 + $0x8] sm:$0xff] }
   0x3   :  { %v308_v9 = vpack.c.bf16 %v27_v6, %v26_v3  ;;  %v311_v10 = vpack.c.bf16 %v111_v8, %v110_v7  ;;  %v23_v11 = vld [vmem:[%s414_s0] sm:$0xff]  ;;  %v112_v12 = vld [vmem:[%s413_s4 + $0x10] sm:$0xff]  ;;  %v113_v13 = vld [vmem:[%s413_s4 + $0x18] sm:$0xff]  ;;  %v225_v53 = vand.u32 127, %v224_v52  ;;  %320 = vset.pattern.permute.xlu0 %v332_v59 }
   0x4   :  { %306 = vmatpush3.bf16.msra.mxu0 %v305_v5  ;;  %v314_v14 = vpack.c.bf16 %v113_v13, %v112_v12  ;;  %v268_v15 = vld [vmem:[%s415_s3] ss:$0 sm:$0xff] }
   0x5   :  { %307 = vmatprep.subr.bf16.mxu0 %v329_v0  ;;  %312 = vmatpush3.bf16.msra.mxu1 %v311_v10  ;;  %v270_v20 = vld [vmem:[%s416_s5] ss:$0 sm:$0xff]  ;;  %vm254_vm6 = vcmp.eq.s32.totalorder %v225_v53, 2  ;;  %vm253_vm7 = vcmp.eq.s32.totalorder %v225_v53, 1  ;;  %vm251_vm8 = vcmp.eq.s32.totalorder %v225_v53, 0 }
   0x6   :  { %313 = vmatprep.subr.bf16.mxu1 %v329_v0  ;;  %v207_v30 = vld [vmem:[%s417_s1] sm:$0xff] }
   0x7   :  { %v208_v31 = vshrl.u32 %v207_v30, 8 }
   0x8   :  { %309 = vmatpush3.bf16.msra.mxu0 %v308_v9 }
   0x9   :  { %315 = vmatpush3.bf16.msra.mxu1 %v314_v14  ;;  %v209_v32 = vshrl.u32 %v208_v31, 16  ;;  %v210_v33 = vand.u32 65535, %v208_v31 }
   0xb   :  { %291 = vmatmul.mubr.msk.f32.vlgmr.msra.gmra.mrb[0].mxu0 %vm35_vm1, %v23_v11  ;;  %v211_v34 = vcvt.s32.f32 %v209_v32  ;;  %v213_v36 = vcvt.s32.f32 %v210_v33 }
   0xd   :  { %v212_v35 = vmul.f32 65536.0, %v211_v34 }
   0xf   :  { %v214_v37 = vadd.f32 %v213_v36, %v212_v35 }
  0x11   :  { %v215_v38 = vadd.f32 0.5, %v214_v37 }
  0x13   :  { %v216_v39 = vmul.f32 5.9604645e-08, %v215_v38 }
  0xde   :  { %v105_v16 = vpop.f32.mrb[0].mxu0 }
  0xdf   :  { %v106_v17 = vadd.f32 %v268_v15, %v105_v16  ;;  %v292_v18 = vpop.f32.mrb[1].mxu0 }
  0xe1   :  { %v109_v19 = vmax.f32 %v106_v17, 0.0 }
  0xe3   :  { %302 = vmatmul.mubr.msk.f32.vlgmr.msra.gmra.mrb[0].mxu1 %vm35_vm1, %v109_v19 }
 0x1b6   :  { %v190_v21 = vpop.f32.mrb[0].mxu1 }
 0x1b7   :  { %v191_v22 = vadd.f32 %v270_v20, %v190_v21  ;;  %v303_v23 = vpop.f32.mrb[1].mxu1 }
 0x1b9   :  { %v195_v24 = vsel %vm194_vm2, %v191_v22, -inf }
 0x1ba   :  { %196 = vmax.xlane.f32.xlu0 %v195_v24 }
 0x247   :  { %v197_v25 = vpop.xlane.xlu0 %196 }
 0x248   :  { %v198_v26 = vsub.f32 %v191_v22, %v197_v25 }
 0x24a   :  { %v199_v27 = vmul.f32 1.442695, %v198_v26 }
 0x24c   :  { %321 = vpow2.f32 %v199_v27 }
 0x24d   :  { %323 = vlog2.f32 %v216_v39 }
 0x256   :  { %v322_v28 = vpop.eup %321 }
 0x257   :  { %v201_v29 = vsel %vm194_vm2, %v322_v28, 0.0  ;;  %v324_v40 = vpop.eup %323 }
 0x258   :  { %202 = vadd.xlane.f32.xlu0 %v201_v29  ;;  %v218_v41 = vmul.f32 0.6931472, %v324_v40 }
 0x25a   :  { %v219_v42 = vsub.f32 0.0, %v218_v41 }
 0x25c   :  { %325 = vlog2.f32 %v219_v42 }
 0x266   :  { %v326_v44 = vpop.eup %325 }
 0x267   :  { %v221_v45 = vmul.f32 0.6931472, %v326_v44 }
 0x269   :  { %v222_v48 = vsub.f32 0.0, %v221_v45 }
 0x2e5   :  { %v203_v43 = vpop.xlane.xlu0 %202 }
 0x2e6   :  { %327 = vlog2.f32 %v203_v43 }
 0x2f0   :  { %v328_v46 = vpop.eup %327 }
 0x2f1   :  { %v205_v47 = vmul.f32 0.6931472, %v328_v46 }
 0x2f3   :  { %v206_v49 = vsub.f32 %v198_v26, %v205_v47 }
 0x2f5   :  { %v223_v50 = vadd.f32 %v222_v48, %v206_v49 }
 0x2f7   :  { %v226_v51 = vsel %vm194_vm2, %v223_v50, -inf }
 0x2f8   :  { %227 = vmax.xlane.f32.xlu1 %v226_v51 }
 0x385   :  { %v228_v54 = vpop.xlane.xlu1 %227 }
 0x386   :  { %vm229_vm3 = vcmp.eq.f32.partialorder %v223_v50, %v228_v54 }
 0x387   :  { %v230_v55 = vsel %vm229_vm3, %v225_v53, 4294967295 }
 0x388   :  { %v231_v56 = vsel %vm194_vm2, %v230_v55, 2147483648 }
 0x389   :  { %v233_v57 = vshra.s32 %v231_v56, 16  ;;  %v232_v60 = vand.u32 65535, %v231_v56 }
 0x38b   :  { %v235_v58 = vcvt.s32.f32 %v233_v57  ;;  %v234_v62 = vcvt.s32.f32 %v232_v60 }
 0x38d   :  { %236 = vmax.xlane.f32.xlu1 %v235_v58 }
 0x41a   :  { %v237_v61 = vpop.xlane.xlu1 %236 }
 0x41b   :  { %vm238_vm4 = vcmp.eq.f32.partialorder %v235_v58, %v237_v61  ;;  %v243_v0 = vcvt.f32.s32 %v237_v61 }
 0x41c   :  { %v239_v63 = vsel %vm238_vm4, %v234_v62, -inf }
 0x41d   :  { %240 = vmax.xlane.f32.xlu0 %v239_v63  ;;  %v244_v2 = vshll.u32 %v243_v0, 16 }
 0x433   :  { %257 = vperm.xlu0 %320, %v191_v22  }
 0x4aa   :  { %v241_v1 = vpop.xlane.xlu0 %240 }
 0x4ab   :  { %v242_v3 = vcvt.f32.s32 %v241_v1 }
 0x4ad   :  { %v245_v4 = vadd.s32 %v244_v2, %v242_v3 }
 0x4af   :  { %vm246_vm5 = vcmp.eq.s32.totalorder %v225_v53, %v245_v4  ;;  %v252_v8 = vcvt.s32.f32 %v245_v4 }
 0x4b0   :  { %v247_v5 = vsel %vm246_vm5, %v206_v49, 0.0 }
 0x4b1   :  { %v248_v6 = vsel %vm194_vm2, %v247_v5, 0.0 }
 0x4b2   :  { %249 = vadd.xlane.f32.xlu1 %v248_v6  ;;  %v258_v7 = vpop.permute.xlu0 %257 }
 0x4b3   :  { %v260_v9 = vsel %vm254_vm6, %v258_v7, 0.0 }
 0x53f   :  { %v250_v10 = vpop.xlane.xlu1 %249 }
 0x540   :  { %v261_v11 = vsel %vm253_vm7, %v250_v10, %v260_v9 }
 0x541   :  { %v262_v12 = vsel %vm251_vm8, %v252_v8, %v261_v11 }
 0x542   :  { %263 = vst [vmem:[%s418_s6] sm:$0xff] %v262_v12 }

</bundles_post_ra>
